<compile_context>
chip_gen: v5e
topology: v5e:2x2
jax: 0.10.0
libtpu: 0.0.40
codegen_flags: <defaults>
</compile_context>

<pallas_src>
import jax
import jax.numpy as jnp
from jax import lax
from jax.experimental import pallas as pl
from jax.experimental.pallas import tpu as pltpu


# Cap on the trace-time unroll of per-batch-row MXU matmuls.  The sequence-split
# (long-S) regime always lands at TB = 8, which is where the MXU path matters.
_MXU_MAX_BATCH_TILE = 32


def _cdiv(a: int, b: int) -> int:
    return -(-a // b)


def _round_up(a: int, b: int) -> int:
    return _cdiv(a, b) * b


def _vmem_budget():
    """(target x-tile bytes in f32-equivalent units, vmem_limit_bytes) per TPU gen."""
    try:
        cap = int(pltpu.get_tpu_info().vmem_capacity_bytes)
    except Exception:  # not on a known TPU / API mismatch -> conservative (v7x-sized)
        cap = 64 * 1024 * 1024
    if cap >= 96 * 1024 * 1024:
        # v5e / v6e: 128 MiB physical VMEM.
        return 24 * 1024 * 1024, 96 * 1024 * 1024
    # v7x (64 MiB per TensorCore) or unknown: stay well under the physical capacity.
    return 16 * 1024 * 1024, 56 * 1024 * 1024


def _choose_tiles(B: int, S: int, H: int, work_itemsize: int, target_bytes: int):
    """Pick (TB, TS) for x blocks (TB, TS, H), mask blocks (TB, TS), out blocks (TB, H).

    Blocked dims are either full array dims or (8 / 128)-aligned.  Sizes are measured
    at `work_itemsize` bytes/element so the in-kernel f32 working set of sub-f32
    inputs is budgeted too (keeps v7x's 64 MiB VMEM safe).
    """
    slab = S * H * work_itemsize                  # one full-sequence batch row of x
    tb_unit = 8 if B >= 8 else B                  # TB multiple of 8, or the full batch
    # v7x megacore: keep >= 2 blocks on the "parallel" batch axis whenever B >= 16 so
    # both TensorCores get work; harmless (one extra 0.35us step) on single-TC v5e/v6e.
    tb_cap = _round_up(_cdiv(B, 2), tb_unit) if B >= 16 else B

    if tb_unit * slab <= target_bytes:
        # Short sequences: keep the full sequence, grow the batch tile.
        tb = min(tb_cap, max(tb_unit, (target_bytes // slab) // tb_unit * tb_unit))
        nb = _cdiv(B, tb)
        tb = B if nb == 1 else _round_up(_cdiv(B, nb), tb_unit)
        return tb, S

    # Long sequences: split the reduction axis too.  TS is a multiple of 128 so the
    # squeezed (TB, TS) mask block stays lane-aligned; a ragged final S block is
    # handled in-kernel (zero-padded mask + NaN-safe select), never by padding x.
    tb = tb_unit
    ts = max(128, (target_bytes // (tb * H * work_itemsize)) // 128 * 128)
    if ts >= S:
        return tb, S
    ns = _cdiv(S, ts)
    ts = _round_up(_cdiv(S, ns), 128)
    # TODO(synk): very large H (e.g. > ~4K f32) would also need a (parallel) H grid
    # axis to keep the minimum (TB, 128, H) block inside VMEM and to feed both v7x
    # TensorCores when B is tiny.
    return tb, ts


def _make_kernel(tb: int, use_mxu: bool, s_ragged: bool, use_scratch: bool):
    """Build the kernel body for the chosen compute path."""

    def _vpu_contribution(x_ref, m_ref):
        m = m_ref[...]                                  # (TB, TS) f32 in {0, 1}
        x = x_ref[...].astype(jnp.float32)
        if s_ragged:
            # Final S block is ragged: x holds undefined data past the true S, so use
            # a NaN-safe select against the zero-padded mask instead of a multiply.
            return jnp.sum(jnp.where(m[:, :, None] != 0.0, x, 0.0), axis=1)
        # Mask is exactly {0.0, 1.0}: a straight multiply replaces compare+select.
        return jnp.sum(x * m[:, :, None], axis=1)

    def _mxu_accumulate(x_ref, m_ref, acc_ref):
        # Masked sum as per-batch-row (1, TS) @ (TS, H) MXU matmuls (unrolled at trace
        # time; TB <= _MXU_MAX_BATCH_TILE on this path).  This keeps the s-reduction on
        # the MXU instead of a mask broadcast relayout + cross-sublane VPU add chain,
        # and never materializes an f32 upcast of the whole x tile.
        for r in range(tb):
            acc_ref[r:r + 1, :] += lax.dot_general(
                m_ref[r:r + 1, :].astype(x_ref.dtype), x_ref[r],
                dimension_numbers=(((1,), (0,)), ((), ())),
                preferred_element_type=jnp.float32)

    if use_scratch:
        # Sub-f32 outputs: accumulate in an f32 VMEM scratch, cast once at the end.
        def kernel(x_ref, m_ref, o_ref, acc_ref):
            s = pl.program_id(1)

            @pl.when(s == 0)
            def _init():
                acc_ref[...] = jnp.zeros_like(acc_ref)

            if use_mxu:
                _mxu_accumulate(x_ref, m_ref, acc_ref)
            else:
                acc_ref[...] += _vpu_contribution(x_ref, m_ref)

            @pl.when(s == pl.num_programs(1) - 1)
            def _finalize():
                o_ref[...] = acc_ref[...].astype(o_ref.dtype)
    else:
        # f32 outputs: the output block index is constant over the s axis, so it stays
        # resident in VMEM -- accumulate directly into it (no scratch, no extra copy).
        def kernel(x_ref, m_ref, o_ref):
            s = pl.program_id(1)

            @pl.when(s == 0)
            def _init():
                o_ref[...] = jnp.zeros_like(o_ref)

            o_ref[...] += _vpu_contribution(x_ref, m_ref)

    return kernel


def sequence_sum_pooler(x: jax.Array, x_mask: jax.Array, *,
                        target_tile_bytes: int | None = None,
                        vmem_limit_bytes: int | None = None) -> jax.Array:
    """x: [B, S, H] float, x_mask: [B, S, 1] (or [B, S]) bool -> [B, H]."""
    B, S, H = x.shape
    # Squeeze the mask to a lane-dense [B, S] float32 {0, 1} plane: avoids the 128-lane
    # padding a trailing singleton dim would cost, and makes multiply / MXU dot exact.
    m = x_mask.reshape(B, S).astype(jnp.bool_).astype(jnp.float32)

    auto_target, auto_limit = _vmem_budget()
    target = auto_target if target_tile_bytes is None else target_tile_bytes
    vmem_limit = auto_limit if vmem_limit_bytes is None else vmem_limit_bytes

    itemsize = jnp.dtype(x.dtype).itemsize
    work_itemsize = max(itemsize, 4)          # budget the f32 in-kernel working set too
    TB, TS = _choose_tiles(B, S, H, work_itemsize, target)
    nb, ns = _cdiv(B, TB), _cdiv(S, TS)

    # x is never padded in HBM (that would be a full extra read+write pass of the
    # tensor).  Only the tiny mask is zero-padded along S so ragged sequence tails
    # contribute nothing; ragged batch tails only touch output rows that Pallas'
    # clamped writeback drops.
    S_pad = ns * TS
    s_ragged = S_pad != S
    if s_ragged:
        m = jnp.pad(m, ((0, 0), (0, S_pad - S)))

    is_f32 = x.dtype == jnp.float32
    # MXU path: exact for {0,1} masks with sub-f32 float inputs (bf16/f16 products are
    # exact, accumulation is f32).  f32 stays on the VPU multiply (an MXU dot would
    # need precision=HIGHEST and extra passes).  TB is capped so the trace-time
    # per-row unroll stays small; the sequence-split regime (TB == 8) always qualifies.
    use_mxu = (jnp.issubdtype(x.dtype, jnp.floating) and itemsize < 4
               and not s_ragged and TB <= _MXU_MAX_BATCH_TILE)
    use_scratch = not is_f32

    kernel = _make_kernel(TB, use_mxu, s_ragged, use_scratch)
    scratch_shapes = [pltpu.VMEM((TB, H), jnp.float32)] if use_scratch else []

    # TODO(synk): on v6e a pipeline_mode=pl.Buffered(3) on the x BlockSpec could smooth
    # DMA jitter (plenty of VMEM there); omitted to keep the spec maximally portable.
    return pl.pallas_call(
        kernel,
        out_shape=jax.ShapeDtypeStruct((B, H), x.dtype),
        grid_spec=pltpu.PrefetchScalarGridSpec(
            num_scalar_prefetch=0,
            grid=(nb, ns),                          # seq (reduction) axis innermost
            in_specs=[
                pl.BlockSpec((TB, TS, H), lambda b, s: (b, s, 0)),
                pl.BlockSpec((TB, TS), lambda b, s: (b, s)),
            ],
            out_specs=pl.BlockSpec((TB, H), lambda b, s: (b, 0)),
            scratch_shapes=scratch_shapes,
        ),
        compiler_params=pltpu.CompilerParams(
            dimension_semantics=("parallel", "arbitrary"),
            vmem_limit_bytes=vmem_limit,
        ),
    )(x, m)


def _reference(x, x_mask):
    mask = x_mask.reshape(x.shape[0], x.shape[1], 1).astype(jnp.bool_)
    return jnp.sum(jnp.where(mask, x.astype(jnp.float32), 0.0), axis=-2).astype(x.dtype)


if __name__ == "__main__":
    # --- primary (module-sized) test: B=2, S=8, H=32, f32, single block ---
    kx, km = jax.random.split(jax.random.PRNGKey(0))
    B, S, H = 2, 8, 32
    x = jax.random.normal(kx, (B, S, H), dtype=jnp.float32)
    x_mask = jax.random.bernoulli(km, p=0.7, shape=(B, S, 1))

    out = jax.block_until_ready(sequence_sum_pooler(x, x_mask))
    assert out.shape == (B, H) and out.dtype == x.dtype
    assert jnp.allclose(out, _reference(x, x_mask), atol=1e-5, rtol=1e-5)

    # --- exercise the tiled paths at small shapes (tiny tile targets) ---
    # 1) batch-tiled path with a ragged batch tail (no padding of x).
    k1, k2 = jax.random.split(jax.random.PRNGKey(1))
    xb = jax.random.normal(k1, (100, 8, 32), dtype=jnp.float32)
    mb = jax.random.bernoulli(k2, p=0.6, shape=(100, 8, 1))
    ob = jax.block_until_ready(sequence_sum_pooler(xb, mb, target_tile_bytes=8 * 1024))
    assert jnp.allclose(ob, _reference(xb, mb), atol=1e-4, rtol=1e-4)

    # 2) sequence-split path with a ragged S tail (NaN-safe select, mask-only padding).
    k3, k4 = jax.random.split(jax.random.PRNGKey(2))
    xs = jax.random.normal(k3, (10, 260, 32), dtype=jnp.float32)
    ms = jax.random.bernoulli(k4, p=0.6, shape=(10, 260, 1))
    os_ = jax.block_until_ready(sequence_sum_pooler(xs, ms, target_tile_bytes=64 * 1024))
    assert jnp.allclose(os_, _reference(xs, ms), atol=1e-4, rtol=1e-4)

    # 3) sequence-split, evenly dividing S: f32 multiply path accumulating into o_ref.
    k5, k6 = jax.random.split(jax.random.PRNGKey(3))
    xe = jax.random.normal(k5, (12, 256, 32), dtype=jnp.float32)
    me = jax.random.bernoulli(k6, p=0.6, shape=(12, 256, 1))
    oe = jax.block_until_ready(sequence_sum_pooler(xe, me, target_tile_bytes=48 * 1024))
    assert jnp.allclose(oe, _reference(xe, me), atol=1e-4, rtol=1e-4)

    # 4) bf16 inputs: MXU per-row dot path with the f32 VMEM accumulator.
    k7, k8 = jax.random.split(jax.random.PRNGKey(4))
    xh = jax.random.normal(k7, (8, 256, 128), dtype=jnp.bfloat16)
    mh = jax.random.bernoulli(k8, p=0.6, shape=(8, 256, 1))
    oh = jax.block_until_ready(sequence_sum_pooler(xh, mh, target_tile_bytes=256 * 1024))
    assert oh.dtype == jnp.bfloat16
    assert jnp.allclose(oh.astype(jnp.float32),
                        _reference(xh, mh).astype(jnp.float32), atol=0.2, rtol=0.1)

    print("KERNEL_OK")
</pallas_src>

<mosaic_0001>
module attributes {stable_mosaic.version = 11 : i64} {
  func.func @kernel(%arg0: i32, %arg1: i32, %arg2: memref<2x8x32xf32, #tpu.memory_space<vmem>>, %arg3: memref<2x8xf32, #tpu.memory_space<vmem>>, %arg4: memref<2x32xf32, #tpu.memory_space<vmem>>) attributes {dimension_semantics = [#tpu.dimension_semantics<parallel>, #tpu.dimension_semantics<arbitrary>], iteration_bounds = array<i64: 1, 1>, scalar_prefetch = 0 : i64, scratch_operands = 0 : i64, tpu.core_type = #tpu.core_type<tc>, window_params = [{transform_indices = @transform_0, window_bounds = array<i64: 2, 8, 32>}, {transform_indices = @transform_1, window_bounds = array<i64: 2, 8>}, {transform_indices = @transform_2, window_bounds = array<i64: 2, 32>}]} {
    %c0_i32 = arith.constant 0 : i32
    %0 = arith.cmpi eq, %arg1, %c0_i32 : i32
    %1 = arith.extui %0 : i1 to i32
    %c0_i32_0 = arith.constant 0 : i32
    %2 = arith.cmpi ne, %1, %c0_i32_0 : i32
    scf.if %2 {
      %cst_9 = arith.constant 0.000000e+00 : f32
      %12 = vector.broadcast %cst_9 : f32 to vector<2x32xf32>
      %c0_10 = arith.constant 0 : index
      %c0_11 = arith.constant 0 : index
      %13 = vector.load %arg4[%c0_10, %c0_11] : memref<2x32xf32, #tpu.memory_space<vmem>>, vector<2x32xf32>
      tpu.vector_store %arg4[%c0_10, %c0_11], %12 {strides = array<i32>} : memref<2x32xf32, #tpu.memory_space<vmem>>, vector<2x32xf32>,
    } else {
    }
    %c0 = arith.constant 0 : index
    %c0_1 = arith.constant 0 : index
    %3 = vector.load %arg4[%c0, %c0_1] : memref<2x32xf32, #tpu.memory_space<vmem>>, vector<2x32xf32>
    %c0_2 = arith.constant 0 : index
    %c0_3 = arith.constant 0 : index
    %4 = vector.load %arg3[%c0_2, %c0_3] : memref<2x8xf32, #tpu.memory_space<vmem>>, vector<2x8xf32>
    %c0_4 = arith.constant 0 : index
    %c0_5 = arith.constant 0 : index
    %c0_6 = arith.constant 0 : index
    %5 = vector.load %arg2[%c0_4, %c0_5, %c0_6] : memref<2x8x32xf32, #tpu.memory_space<vmem>>, vector<2x8x32xf32>
    %6 = vector.shape_cast %4 : vector<2x8xf32> to vector<2x8x1xf32>
    %7 = vector.broadcast %6 : vector<2x8x1xf32> to vector<2x8x32xf32>
    %8 = arith.mulf %5, %7 : vector<2x8x32xf32>
    %cst = arith.constant dense<0.000000e+00> : vector<2x32xf32>
    %9 = vector.multi_reduction <add>, %8, %cst [1] : vector<2x8x32xf32> to vector<2x32xf32>
    %10 = arith.addf %3, %9 : vector<2x32xf32>
    %c0_7 = arith.constant 0 : index
    %c0_8 = arith.constant 0 : index
    %11 = vector.load %arg4[%c0_7, %c0_8] : memref<2x32xf32, #tpu.memory_space<vmem>>, vector<2x32xf32>
    tpu.vector_store %arg4[%c0_7, %c0_8], %10 {strides = array<i32>} : memref<2x32xf32, #tpu.memory_space<vmem>>, vector<2x32xf32>,
    return
  }
  func.func @transform_0(%arg0: i32, %arg1: i32) -> (i32, i32, i32) {
    %c0_i32 = arith.constant 0 : i32
    %c0_i32_0 = arith.constant 0 : i32
    return %arg0, %arg1, %c0_i32 : i32, i32, i32
  }
  func.func @transform_1(%arg0: i32, %arg1: i32) -> (i32, i32) {
    %c0_i32 = arith.constant 0 : i32
    return %arg0, %arg1 : i32, i32
  }
  func.func @transform_2(%arg0: i32, %arg1: i32) -> (i32, i32) {
    %c0_i32 = arith.constant 0 : i32
    %c0_i32_0 = arith.constant 0 : i32
    return %arg0, %c0_i32 : i32, i32
  }
}

</mosaic_0001>

<bundles_post_ra>
// kernel: tpu_custom_call.1
= control target key start
LH: loop header
LB: loop body
LE: loop exit
PB: predicated region body
PF: predicated region fallthrough
CT: control target
= control target key end

     0   :  { %7 = vsyncpa [#allocation3], 0  ;;  %s226_s0 = inlined_call_operand.hbm [shape: f32[2,8,32], index: 0, kind: input, shape index: {}]   ;;  %s227_s1 = inlined_call_operand.hbm [shape: f32[2,8], index: 1, kind: input, shape index: {}]   ;;  %s228_s2 = inlined_call_operand.hbm [shape: f32[2,32], index: 2, kind: output, shape index: {}]  }
   0x1   :  { %8 = vsyncpa [#allocation6], 0 }
   0x2   :  { %9 = vsyncpa [#allocation4], 0  ;;  %s14_s11 = sshll.u32 %s226_s0, 4  ;;  %s194_s12 = smov [#allocation2]   ;;  %s15_s11 = int_to_ptr.hbm [resolvable:$true] %s14_s11 }
   0x3   :  { %s16_s13 = sshll.u32 %s194_s12, 4  ;;  %s28_s16 = sshll.u32 %s227_s1, 4  ;;  %s17_s13 = int_to_ptr.vmem [resolvable:$true] %s16_s13  ;;  %s29_s16 = int_to_ptr.hbm [resolvable:$true] %s28_s16 }
   0x4   :  { %s195_s17 = smov 128   ;;  %s196_s18 = smov 8  }
   0x5   :  { %22 = dma.hbm_to_vmem [thread:$0]  %s15_s11, 256, %s17_s13, [#allocation3], %s195_s17, %s195_s17, %s196_s18  }
   0x6   :  { %s197_s19 = smov [#allocation5]  }
   0x7   :  { %s30_s20 = sshll.u32 %s197_s19, 4  ;;  %s31_s20 = int_to_ptr.vmem [resolvable:$true] %s30_s20 }
   0x8   :  { %33 = dma.hbm_to_vmem [thread:$0]  %s29_s16, 32, %s31_s20, [#allocation6]  }
   0x9   :  { %188 = dma.done.wait [#allocation3], 256  }
   0xa   :  { %189 = vsyncadd [#allocation3], 4294967040 }
   0xb   :  { %190 = dma.done.wait [#allocation6], 32  }
   0xc   :  { %191 = vsyncadd [#allocation6], 4294967264  ;;  %v53_v0 = vlaneseq  ;;  %v49_v2 = vld [vmem:[#allocation5] sm:$0x3]  ;;  %vm46_vm0 = vcmask 254976   ;;  %v198_v5 = vmov 0.0  }
   0xd   :  { %v52_v3 = vperm.slane %v49_v2, 0  ;;  %v59_v4 = vperm.slane %v49_v2, 1  ;;  %47 = vst.msk [vmem:[#allocation7] sm:$0x3] %vm46_vm0, %v198_v5  ;;  %v50_v6 = vld [vmem:[#allocation2] sm:$0xff]  ;;  %vm68_vm1 = vcmask 261120  }
   0xe   :  { %v54_v1 = vshrl.u32 %v53_v0, 7  ;;  %v51_v12 = vld [vmem:[#allocation2 + $0x8] sm:$0xff]  ;;  %vm85_vm2 = vcmask 1041409   ;;  %s199_s0 = smov [#allocation7]   ;;  %s98_s23 = sshll.u32 %s228_s2, 4  ;;  %s99_s23 = int_to_ptr.hbm [resolvable:$true] %s98_s23 }
   0xf   :  { %s96_s1 = sshll.u32 %s199_s0, 4  ;;  %s97_s1 = int_to_ptr.vmem [resolvable:$true] %s96_s1 }
  0x10   :  { %115 = vset.pattern.permute.xlu0 %v54_v1 }
  0x14   :  { %v48_v26 = vld [vmem:[#allocation7] sm:$0x3] }
  0x18   :  { %57 = vperm.xlu0 %115, %v52_v3  }
  0x20   :  { %64 = vperm.xlu0 %115, %v59_v4  }
  0x8a   :  { %v58_v7 = vpop.permute.xlu0 %57 }
  0x8b   :  { %v66_v8 = vmul.f32 %v58_v7, %v50_v6 }
  0x8d   :  { %v69_v9 = vsel %vm68_vm1, %v66_v8, 0.0 }
  0x8e   :  { %v70_v10 = vrot.slane %v69_v9, 4 }
  0x90   :  { %v71_v11 = vadd.f32 %v70_v10, %v69_v9 }
  0x92   :  { %v65_v13 = vpop.permute.xlu0 %64  ;;  %v72_v15 = vrot.slane %v71_v11, 2 }
  0x93   :  { %v67_v14 = vmul.f32 %v65_v13, %v51_v12 }
  0x94   :  { %v73_v18 = vadd.f32 %v72_v15, %v71_v11 }
  0x95   :  { %v76_v16 = vsel %vm68_vm1, %v67_v14, 0.0 }
  0x96   :  { %v77_v17 = vrot.slane %v76_v16, 4  ;;  %v74_v21 = vrot.slane %v73_v18, 1 }
  0x98   :  { %v78_v19 = vadd.f32 %v77_v17, %v76_v16  ;;  %v75_v24 = vadd.f32 %v74_v21, %v73_v18 }
  0x9a   :  { %v79_v20 = vrot.slane %v78_v19, 2 }
  0x9c   :  { %v80_v22 = vadd.f32 %v79_v20, %v78_v19 }
  0x9e   :  { %v81_v23 = vrot.slane %v80_v22, 1 }
  0xa0   :  { %v82_v25 = vadd.f32 %v81_v23, %v80_v22 }
  0xa2   :  { %v86_v27 = vsel %vm85_vm2, %v82_v25, %v75_v24 }
  0xa3   :  { %v88_v28 = vadd.f32 %v86_v27, %v48_v26 }
  0xa5   :  { %90 = vst.msk [vmem:[#allocation7] sm:$0x3] %vm46_vm0, %v88_v28 }
  0xa6   :  { %101 = dma.vmem_to_hbm [thread:$0]  %s97_s1, 32, %s99_s23, [#allocation4]  }
  0xa7   :  { %192 = dma.done.wait [#allocation4], 32  }
  0xa8   :  { %193 = vsyncadd [#allocation4], 4294967264 }
  0xa9   :  { %106 = vsyncpa [#allocation3], 1 }
  0xaa   :  { %107 = vsyncpa [#allocation6], 1 }
  0xab   :  { %108 = vsyncpa [#allocation4], 1 }

</bundles_post_ra>
